<compile_context>
chip_gen: v7x
topology: tpu7x:2x2x1
jax: 0.10.0
libtpu: 0.0.40
codegen_flags: <defaults>
</compile_context>

<pallas_src>
import jax
import jax.numpy as jnp
from jax.experimental import pallas as pl
from jax.experimental.pallas import tpu as pltpu


def _feedback_mod_kernel(x_ref, mean_ref, wfb_ref, bfb_ref, wg_ref, bg_ref, out_ref):
    tb, n, d = x_ref.shape
    x = x_ref[...]                                         # (TB, N, D), native dtype

    # Per-batch mean over N on the MXU: block-diagonal (TB, TB*N) @ (TB*N, D).
    x_flat = x.reshape(tb * n, d).astype(jnp.float32)
    g = jnp.dot(mean_ref[...], x_flat,
                preferred_element_type=jnp.float32)        # (TB, D)

    # Feedback projection: (TB, D) @ (D, D) + (1, D), f32 accumulation.
    fb = jnp.dot(g, wfb_ref[...],
                 preferred_element_type=jnp.float32) + bfb_ref[...]

    # Gate: lane-reduction against a (1, D) row (XLU; MXU stays free) +
    # scalar bias from SMEM.
    gate_logit = jnp.sum(g * wg_ref[...], axis=-1, keepdims=True) + bg_ref[0]
    gate = jax.nn.sigmoid(gate_logit)                      # (TB, 1)

    mod = fb * gate                                        # (TB, D), f32

    # Broadcast-modulated residual add, kept in the activation dtype.
    out_ref[...] = (x + mod[:, None, :].astype(x.dtype)).astype(out_ref.dtype)


def feedback_modulation(clusters, w_fb, b_fb, w_gate, b_gate, *, block_b=None):
    """clusters: [B, N, D]; w_fb: [D, D] (in x out = PyTorch weight.T);
    b_fb: [D]; w_gate: [D, 1] (weight.T); b_gate: [1]."""
    B, N, D = clusters.shape
    itemsize = jnp.dtype(clusters.dtype).itemsize

    # Batch tile: ~2 MiB per clusters buffer, but keep >= 2 grid steps when
    # B >= 2 so the "parallel" axis can shard across v7x's 2 TensorCores.
    if block_b is None:
        per_batch_bytes = max(N * D * itemsize, 1)
        block_b = max(1, min(B, (2 << 20) // per_batch_bytes))
        if B >= 2:
            block_b = min(block_b, -(-B // 2))
    grid_b = -(-B // block_b)
    B_pad = grid_b * block_b

    clusters_p = clusters
    if B_pad != B:
        clusters_p = jnp.pad(clusters, ((0, B_pad - B), (0, 0), (0, 0)))

    # Block-diagonal mean matrix: g = mean_mat @ reshape(x, (TB*N, D)).
    rows = jnp.arange(block_b, dtype=jnp.int32)[:, None]
    cols = jnp.arange(block_b * N, dtype=jnp.int32)[None, :]
    mean_mat = (rows == cols // N).astype(jnp.float32) / float(N)  # (TB, TB*N)

    b_fb2 = b_fb.reshape(1, D).astype(jnp.float32)
    wg_row = w_gate.reshape(1, D)                   # (1, D) row -> lane reduction
    bg = b_gate.reshape(1).astype(jnp.float32)      # scalar, goes to SMEM

    # VMEM budget: double-buffered in/out activation blocks + single-buffered
    # constants + headroom.
    block_bytes = block_b * N * D * itemsize
    const_bytes = (D * D) * jnp.dtype(w_fb.dtype).itemsize \
        + 2 * (8 * max(D, 128) * 4) \
        + max(block_b, 8) * max(block_b * N, 128) * 4
    vmem_limit = int(2 * 2 * block_bytes + const_bytes + (4 << 20))
    vmem_limit = min(max(vmem_limit, 16 << 20), 120 << 20)

    grid_spec = pltpu.PrefetchScalarGridSpec(
        num_scalar_prefetch=0,
        grid=(grid_b,),
        in_specs=[
            pl.BlockSpec((block_b, N, D), lambda b: (b, 0, 0)),       # clusters
            pl.BlockSpec((block_b, block_b * N), lambda b: (0, 0),
                         pipeline_mode=pl.Buffered(1)),                # mean matrix
            pl.BlockSpec((D, D), lambda b: (0, 0),
                         pipeline_mode=pl.Buffered(1)),                # W_fb
            pl.BlockSpec((1, D), lambda b: (0, 0),
                         pipeline_mode=pl.Buffered(1)),                # b_fb
            pl.BlockSpec((1, D), lambda b: (0, 0),
                         pipeline_mode=pl.Buffered(1)),                # w_gate row
            pl.BlockSpec(memory_space=pltpu.MemorySpace.SMEM),         # b_gate
        ],
        out_specs=pl.BlockSpec((block_b, N, D), lambda b: (b, 0, 0)),
    )

    out = pl.pallas_call(
        _feedback_mod_kernel,
        out_shape=jax.ShapeDtypeStruct((B_pad, N, D), clusters.dtype),
        grid_spec=grid_spec,
        compiler_params=pltpu.CompilerParams(
            dimension_semantics=("parallel",),
            vmem_limit_bytes=vmem_limit,
        ),
    )(clusters_p, mean_mat, w_fb, b_fb2, wg_row, bg)

    return out[:B] if B_pad != B else out


def feedback_modulation_ref(clusters, w_fb, b_fb, w_gate, b_gate):
    """Pure-JAX reference matching the PyTorch forward (f32 matmuls)."""
    g = clusters.mean(axis=1)                                       # (B, D)
    fb = jnp.dot(g, w_fb, precision=jax.lax.Precision.HIGHEST) + b_fb
    gate = jax.nn.sigmoid(
        jnp.dot(g, w_gate, precision=jax.lax.Precision.HIGHEST) + b_gate)
    return clusters + fb[:, None, :] * gate[:, None, :]


if __name__ == "__main__":
    # Small but lane-dense demo shapes: D is a multiple of 128 so stores are
    # unmasked; B=8 with TB=4 gives a 2-step grid.
    B, N, D = 8, 8, 128   # batch, num clusters (seq), d_model

    key = jax.random.PRNGKey(0)
    k_x, k_wfb, k_bfb, k_wg, k_bg = jax.random.split(key, 5)

    clusters = jax.random.normal(k_x, (B, N, D), dtype=jnp.float32)

    # Deterministic "Linear" params (stored as [in, out] = PyTorch weight.T).
    bound = 1.0 / (D ** 0.5)
    w_fb = jax.random.uniform(k_wfb, (D, D), jnp.float32, -bound, bound)
    b_fb = jax.random.uniform(k_bfb, (D,), jnp.float32, -bound, bound)
    w_gate = jax.random.uniform(k_wg, (D, 1), jnp.float32, -bound, bound)
    b_gate = jax.random.uniform(k_bg, (1,), jnp.float32, -bound, bound)

    out = feedback_modulation(clusters, w_fb, b_fb, w_gate, b_gate)
    out = jax.block_until_ready(out)

    ref = feedback_modulation_ref(clusters, w_fb, b_fb, w_gate, b_gate)
    assert out.shape == (B, N, D)
    max_err = jnp.max(jnp.abs(out - ref))
    assert jnp.allclose(out, ref, atol=1e-4, rtol=1e-4), f"mismatch, max|diff|={max_err}"

    print("KERNEL_OK")
</pallas_src>

<mosaic_0001>
module attributes {stable_mosaic.version = 11 : i64} {
  func.func @_feedback_mod_kernel(%arg0: i32, %arg1: memref<4x8x128xf32, #tpu.memory_space<vmem>>, %arg2: memref<4x32xf32, #tpu.memory_space<vmem>>, %arg3: memref<128x128xf32, #tpu.memory_space<vmem>>, %arg4: memref<1x128xf32, #tpu.memory_space<vmem>>, %arg5: memref<1x128xf32, #tpu.memory_space<vmem>>, %arg6: memref<1xf32, #tpu.memory_space<smem>>, %arg7: memref<4x8x128xf32, #tpu.memory_space<vmem>>) attributes {dimension_semantics = [#tpu.dimension_semantics<parallel>], iteration_bounds = array<i64: 2>, scalar_prefetch = 0 : i64, scratch_operands = 0 : i64, tpu.core_type = #tpu.core_type<tc>, window_params = [{transform_indices = @transform_0, window_bounds = array<i64: 4, 8, 128>}, {pipeline_mode = #tpu.pipeline_mode<synchronous>, transform_indices = @transform_1, window_bounds = array<i64: 4, 32>}, {pipeline_mode = #tpu.pipeline_mode<synchronous>, transform_indices = @transform_2, window_bounds = array<i64: 128, 128>}, {pipeline_mode = #tpu.pipeline_mode<synchronous>, transform_indices = @transform_3, window_bounds = array<i64: 1, 128>}, {pipeline_mode = #tpu.pipeline_mode<synchronous>, transform_indices = @transform_4, window_bounds = array<i64: 1, 128>}, {transform_indices = @transform_5, window_bounds = array<i64: 1>}, {transform_indices = @transform_6, window_bounds = array<i64: 4, 8, 128>}]} {
    %c0 = arith.constant 0 : index
    %c0_0 = arith.constant 0 : index
    %c0_1 = arith.constant 0 : index
    %0 = vector.load %arg1[%c0, %c0_0, %c0_1] : memref<4x8x128xf32, #tpu.memory_space<vmem>>, vector<4x8x128xf32>
    %1 = vector.shape_cast %0 : vector<4x8x128xf32> to vector<32x128xf32>
    %c0_2 = arith.constant 0 : index
    %c0_3 = arith.constant 0 : index
    %2 = vector.load %arg2[%c0_2, %c0_3] : memref<4x32xf32, #tpu.memory_space<vmem>>, vector<4x32xf32>
    %cst = arith.constant dense<0.000000e+00> : vector<4x128xf32>
    %3 = tpu.matmul %2, %1, %cst {dimension_numbers = #tpu.dot_dimension_numbers<[1], [0], [0], [1], [0, 0, 1, 1], [], []>} : vector<4x32xf32>, vector<32x128xf32>, vector<4x128xf32> -> vector<4x128xf32>
    %c0_4 = arith.constant 0 : index
    %c0_5 = arith.constant 0 : index
    %4 = vector.load %arg3[%c0_4, %c0_5] : memref<128x128xf32, #tpu.memory_space<vmem>>, vector<128x128xf32>
    %cst_6 = arith.constant dense<0.000000e+00> : vector<4x128xf32>
    %5 = tpu.matmul %3, %4, %cst_6 {dimension_numbers = #tpu.dot_dimension_numbers<[1], [0], [0], [1], [0, 0, 1, 1], [], []>} : vector<4x128xf32>, vector<128x128xf32>, vector<4x128xf32> -> vector<4x128xf32>
    %c0_7 = arith.constant 0 : index
    %c0_8 = arith.constant 0 : index
    %6 = vector.load %arg4[%c0_7, %c0_8] : memref<1x128xf32, #tpu.memory_space<vmem>>, vector<1x128xf32>
    %7 = vector.broadcast %6 : vector<1x128xf32> to vector<4x128xf32>
    %8 = arith.addf %5, %7 : vector<4x128xf32>
    %c0_9 = arith.constant 0 : index
    %c0_10 = arith.constant 0 : index
    %9 = vector.load %arg5[%c0_9, %c0_10] : memref<1x128xf32, #tpu.memory_space<vmem>>, vector<1x128xf32>
    %10 = vector.broadcast %9 : vector<1x128xf32> to vector<4x128xf32>
    %11 = arith.mulf %3, %10 : vector<4x128xf32>
    %cst_11 = arith.constant dense<0.000000e+00> : vector<4xf32>
    %12 = vector.multi_reduction <add>, %11, %cst_11 [1] : vector<4x128xf32> to vector<4xf32>
    %13 = vector.shape_cast %12 : vector<4xf32> to vector<4x1xf32>
    %c0_12 = arith.constant 0 : index
    %14 = memref.load %arg6[%c0_12] : memref<1xf32, #tpu.memory_space<smem>>
    %15 = vector.broadcast %14 : f32 to vector<4x1xf32>
    %16 = arith.addf %13, %15 : vector<4x1xf32>
    %17 = arith.negf %16 : vector<4x1xf32>
    %18 = math.exp %17 : vector<4x1xf32>
    %cst_13 = arith.constant 1.000000e+00 : f32
    %19 = vector.broadcast %cst_13 : f32 to vector<4x1xf32>
    %20 = arith.addf %19, %18 : vector<4x1xf32>
    %21 = arith.divf %19, %20 : vector<4x1xf32>
    %22 = vector.broadcast %21 : vector<4x1xf32> to vector<4x128xf32>
    %23 = arith.mulf %8, %22 : vector<4x128xf32>
    %24 = vector.shape_cast %23 : vector<4x128xf32> to vector<4x1x128xf32>
    %25 = vector.broadcast %24 : vector<4x1x128xf32> to vector<4x8x128xf32>
    %26 = arith.addf %0, %25 : vector<4x8x128xf32>
    %c0_14 = arith.constant 0 : index
    %c0_15 = arith.constant 0 : index
    %c0_16 = arith.constant 0 : index
    %27 = vector.load %arg7[%c0_14, %c0_15, %c0_16] : memref<4x8x128xf32, #tpu.memory_space<vmem>>, vector<4x8x128xf32>
    tpu.vector_store %arg7[%c0_14, %c0_15, %c0_16], %26 {strides = array<i32>} : memref<4x8x128xf32, #tpu.memory_space<vmem>>, vector<4x8x128xf32>,
    return
  }
  func.func @transform_0(%arg0: i32) -> (i32, i32, i32) {
    %c0_i32 = arith.constant 0 : i32
    %c0_i32_0 = arith.constant 0 : i32
    %c0_i32_1 = arith.constant 0 : i32
    return %arg0, %c0_i32, %c0_i32_0 : i32, i32, i32
  }
  func.func @transform_1(%arg0: i32) -> (i32, i32) {
    %c0_i32 = arith.constant 0 : i32
    %c0_i32_0 = arith.constant 0 : i32
    %c0_i32_1 = arith.constant 0 : i32
    return %c0_i32, %c0_i32_0 : i32, i32
  }
  func.func @transform_2(%arg0: i32) -> (i32, i32) {
    %c0_i32 = arith.constant 0 : i32
    %c0_i32_0 = arith.constant 0 : i32
    %c0_i32_1 = arith.constant 0 : i32
    return %c0_i32, %c0_i32_0 : i32, i32
  }
  func.func @transform_3(%arg0: i32) -> (i32, i32) {
    %c0_i32 = arith.constant 0 : i32
    %c0_i32_0 = arith.constant 0 : i32
    %c0_i32_1 = arith.constant 0 : i32
    return %c0_i32, %c0_i32_0 : i32, i32
  }
  func.func @transform_4(%arg0: i32) -> (i32, i32) {
    %c0_i32 = arith.constant 0 : i32
    %c0_i32_0 = arith.constant 0 : i32
    %c0_i32_1 = arith.constant 0 : i32
    return %c0_i32, %c0_i32_0 : i32, i32
  }
  func.func @transform_5(%arg0: i32) -> i32 {
    %c0_i32 = arith.constant 0 : i32
    %c0_i32_0 = arith.constant 0 : i32
    return %c0_i32 : i32
  }
  func.func @transform_6(%arg0: i32) -> (i32, i32, i32) {
    %c0_i32 = arith.constant 0 : i32
    %c0_i32_0 = arith.constant 0 : i32
    %c0_i32_1 = arith.constant 0 : i32
    return %arg0, %c0_i32, %c0_i32_0 : i32, i32, i32
  }
}

</mosaic_0001>

<bundles_post_ra>
// kernel: tpu_custom_call.1
= control target key start
LH: loop header
LB: loop body
LE: loop exit
PB: predicated region body
PF: predicated region fallthrough
CT: control target
= control target key end

     0   :  { %s1236_s0 = inlined_call_operand.hbm [shape: f32[8,8,128], index: 0, kind: input, shape index: {}]   ;;  %s1237_s1 = inlined_call_operand.vmem [shape: f32[4,32], index: 1, kind: input, shape index: {}]   ;;  %s1238_s2 = inlined_call_operand.hbm [shape: f32[128,128], index: 2, kind: input, shape index: {}]   ;;  %s1239_s3 = inlined_call_operand.vmem [shape: f32[1,128], index: 3, kind: input, shape index: {}]   ;;  %s1240_s4 = inlined_call_operand.vmem [shape: f32[1,128], index: 4, kind: input, shape index: {}]   ;;  %s1241_s5 = inlined_call_operand.<no memory space> [shape: f32[1], index: 5, kind: input, shape index: {}]   ;;  %s1242_s6 = inlined_call_operand.hbm [shape: f32[8,8,128], index: 6, kind: output, shape index: {}]  }
   0x1   :  { %11 = sst [smem:[#allocation2]] %s1241_s5 }
   0x2   :  { %12 = vsyncpa [#allocation4], 0 }
   0x3   :  { %14 = vsyncpa [#allocation4 + $0x1], 0 }
   0x4   :  { %15 = vsyncpa [#allocation7], 0 }
   0x5   :  { %16 = vsyncpa [#allocation5], 0 }
   0x6   :  { %18 = vsyncpa [#allocation5 + $0x1], 0  ;;  %s1000_s23 = smov 0   ;;  %s1002_s24 = smov 0  }
   0x7   :  { %s1004_s25 = smov 0   ;;  %s1006_s26 = smov 0  }
   0x8 LB: > { %s1021_s5 = sadd.s32 4294967295, %s949_s26   ;;  %s632_s27 = sadd.s32 4294967294, %s949_s26   ;;  %s949_s26 = sphi %s1006_s26, %s1262_s26   ;;  %s945_s25 = sphi %s1004_s25, %s1261_s25   ;;  %s941_s24 = sphi %s1002_s24, %s1260_s24   ;;  %s937_s23 = sphi %s1000_s23, %s1259_s23  }
   0x9   : > { %p44_p0 = scmp.ne.s32.totalorder %s941_s24, %s937_s23  ;;  %p1243_p1 = scmp.eq.s32.totalorder %s1021_s5, 0 }
   0xa   : > { %p179_p3 = scmp.eq.s32.totalorder %s632_s27, 1  ;;  %p633_p5 = scmp.ge.s32.totalorder %s949_s26, 1 }
   0xb   : > { %p1030_p4 = por %p1243_p1, %p44_p0  ;;  %p186_p7 = scmp.lt.s32.totalorder %s949_s26, 3 }
   0xc   : > { %p1035_p6 = por %p179_p3, %p44_p0  ;;  %s951_s7 = smov [#allocation6]  }
   0xd   : > { %s1246_s28 = scalar_select %p1030_p4, 1, 0 }
   0xe   : > { %s1247_s29 = scalar_select %p1035_p6, 1, 0 }
   0xf   : > { %p1040_p8 = pnand %p633_p5, %p186_p7  ;;  %s201_s8 = sshll.u32 %s951_s7, 4  ;;  %s1044_s8 = int_to_ptr.vmem [resolvable:$true] %s201_s8 }
  0x10   : > { %s1056_s10 = sadd.s32 1, %s949_s26   ;;  %s31_s11 = sadd.s32 1, %s945_s25 }
  0x11   : > { %s1248_s30 = scalar_select %p1040_p8, 1, 0 }
  0x12   : > { %p760_p9 = pneg %p1040_p8  ;;  %s28_s12 = ssub.s32 %s949_s26, %s1056_s10 }
  0x13   : > { %s821_s15 = scalar_lea.hbm %s1238_s2, 2048 }
  0x14   : > { %p1051_p11 = pnand %p760_p9, %p1243_p1  ;;  %p822_p12 = scmp.ne.s32.totalorder %s1238_s2, %s821_s15 }
  0x15   : > { %p828_p5 = scmp.lt.u32.totalorder %s821_s15, %s1238_s2 }
  0x16   : > { %p823_p13 = pneg %p1051_p11 }
  0x18   : > { %p824_p0 = pnand %p823_p13, %p822_p12 }
  0x1a   : > { %p825_p3 = pneg %p824_p0 }
  0x1c   : > { %p830_p7 = pnand %p828_p5, %p825_p3 }
  0x1e   : > { %833 = shalt.err (!%p830_p7)
}
  0x1f   : > { %s834_s20 = scalar_lea.vmem %s1044_s8, 2048  ;;  %p842_p2 = scmp.lt.s32.totalorder %s1044_s8, %s1044_s8 }
  0x20   : > { %p835_p9 = scmp.ne.s32.totalorder %s1044_s8, %s834_s20  ;;  %p843_p6 = scmp.lt.s32.totalorder %s834_s20, %s834_s20 }
  0x22   : > { %p837_p10 = pnand %p835_p9, %p823_p13  ;;  %p844_p4 = por %p843_p6, %p842_p2 }
  0x24   : > { %p838_p1 = pneg %p837_p10 }
  0x26   : > { %p845_p8 = pnand %p844_p4, %p838_p1 }
  0x28   : > { %848 = shalt.err (!%p845_p8)
}
  0x29   : > { %s952_s21 = smov 128   ;;  %s953_s22 = smov 8  }
  0x2a   : > { %763 = dma.hbm_to_vmem [thread:$0]  (!%p1051_p11), %s1238_s2, 2048, %s1044_s8, [#allocation7], %s952_s21, %s952_s21, %s953_s22  }
  0x2b   : > { %p29_p1 = scmp.eq.s32.totalorder %s28_s12, 0  ;;  %p38_p2 = scmp.ne.s32.totalorder %s945_s25, %s941_s24 }
  0x2c   : > { %p39_p4 = scmp.eq.s32.totalorder %s949_s26, 0  ;;  %p773_p6 = scmp.lt.s32.totalorder %s949_s26, 2 }
  0x2d   : > { %s1090_s13 = scalar_select %p29_p1, %s945_s25, %s31_s11  }
  0x2e   : > { %p40_p8 = por %p39_p4, %p38_p2  ;;  %p1250_p10 = scmp.eq.s32.totalorder %s1021_s5, 1 }
  0x2f   : > { %s224_s9 = sand.u32 1, %s945_s25   ;;  %s652_s15 = sshll.u32 %s949_s26, 9 }
  0x30   : > { %p1094_p12 = por %p1250_p10, %p38_p2  ;;  %s636_s16 = sshll.u32 %s224_s9, 5 }
  0x31   : > { %s1103_s19 = scalar_lea.hbm %s1236_s0, %s652_s15  ;;  %s228_s8 = scalar_lea.vmem [#allocation3], %s636_s16 }
  0x32   : > { %s235_s11 = sshll.u32 %s228_s8, 4  ;;  %p1105_p11 = pnand %p773_p6, %p40_p8  ;;  %s1109_s11 = int_to_ptr.vmem [resolvable:$true] %s235_s11 }
  0x33   : > { %s1111_s20 = scalar_lea.sflag [#allocation4], %s224_s9  ;;  %s849_s27 = scalar_lea.hbm %s1103_s19, 512 }
  0x34   : > { %p850_p13 = scmp.ne.s32.totalorder %s1103_s19, %s849_s27  ;;  %p851_p0 = pneg %p1105_p11 }
  0x35   : > { %s854_s16 = scalar_lea.hbm %s1236_s0, 1024  ;;  %p855_p7 = scmp.lt.u32.totalorder %s1103_s19, %s1236_s0 }
  0x36   : > { %p852_p3 = pnand %p851_p0, %p850_p13  ;;  %p856_p9 = scmp.lt.u32.totalorder %s854_s16, %s849_s27 }
  0x37   : > { %p858_p2 = scmp.lt.u32.totalorder %s849_s27, %s1103_s19 }
  0x38   : > { %p853_p5 = pneg %p852_p3  ;;  %p857_p1 = por %p856_p9, %p855_p7 }
  0x3a   : > { %p859_p4 = por %p858_p2, %p857_p1 }
  0x3c   : > { %p860_p6 = pnand %p859_p4, %p853_p5 }
  0x3e   : > { %863 = shalt.err (!%p860_p6)
}
  0x3f   : > { %s864_s9 = scalar_lea.vmem %s1109_s11, 512  ;;  %s954_s8 = smov [#allocation3]  }
  0x40   : > { %p865_p8 = scmp.ne.s32.totalorder %s1109_s11, %s864_s9  ;;  %s869_s7 = sshll.u32 %s954_s8, 4  ;;  %s870_s7 = int_to_ptr.vmem [resolvable:$false] %s869_s7 }
  0x41   : > { %s871_s15 = scalar_lea.vmem %s870_s7, 1024  ;;  %p872_p3 = scmp.lt.s32.totalorder %s1109_s11, %s870_s7 }
  0x42   : > { %p867_p10 = pnand %p865_p8, %p851_p0  ;;  %p873_p7 = scmp.lt.s32.totalorder %s871_s15, %s864_s9 }
  0x44   : > { %p868_p13 = pneg %p867_p10  ;;  %p874_p9 = por %p873_p7, %p872_p3 }
  0x46   : > { %p875_p1 = pnand %p874_p9, %p868_p13 }
  0x48   : > { %878 = shalt.err (!%p875_p1)
}
  0x49   : > { %767 = dma.hbm_to_vmem [thread:$0]  (!%p1105_p11), %s1103_s19, 512, %s1109_s11, %s1111_s20, %s952_s21, %s952_s21, %s953_s22  }
  0x4a   : > { %p1253_p0 = scmp.ne.s32.totalorder %s1248_s30, 0 }
  0x4b   : > { %s1145_s27 = sand.u32 (!%p1253_p0), 1, %s941_s24   ;;  %p1254_p5 = scmp.ne.s32.totalorder (!%p1253_p0), %s1246_s28, 0 }
  0x4c   : > { %247 = sbr.rel (%p1253_p0) target bundleno = 552 (0x228), region = 44  ;;  %s640_s16 = sshll.u32 (!%p1253_p0), %s1145_s27, 5 }
  0x4d   : > { %s250_s17 = scalar_lea.sflag (!%p1253_p0), [#allocation4], %s1145_s27  ;;  %s253_s12 = scalar_lea.vmem (!%p1253_p0), [#allocation3], %s640_s16 }
  0x53   : > { %924 = dma.done.wait (%p1254_p5), %s250_s17, 512  }
  0x54   : > { %926 = vsyncadd (%p1254_p5), %s250_s17, 4294966784  ;;  %p1255_p11 = scmp.eq.s32.totalorder %s1021_s5, 0 }
  0x56   : > { %928 = dma.done.wait (%p1255_p11), [#allocation7], 2048   ;;  %p1256_p2 = pmov %p1255_p11 }
  0x57   : > { %v955_v0 = vmov 0.0|0.0   ;;  %vm956_vm0 = vmmov 0   ;;  %v957_v1 = vmov 0.0   ;;  %v1159_v2 = vld [vmem:[%s253_s12] sm:$0xff]  ;;  %v1161_v3 = vld [vmem:[%s253_s12 + $0x8] sm:$0xff]  ;;  %v1163_v4 = vld [vmem:[%s253_s12 + $0x10] sm:$0xff]  ;;  %v486_v46 = vlaneseq }
  0x58   : > { %930 = vsyncadd (%p1256_p2), [#allocation7], 4294965248  ;;  %722 = vmatprep.subr.bf16.mxu0 %v955_v0  ;;  %684 = vmatprep.mubr.msk.f32.mxu0 %vm956_vm0, %v957_v1  ;;  %v723_v5 = vpack.c.bf16 %v1161_v3, %v1159_v2  ;;  %v1167_v6 = vld [vmem:[%s253_s12 + $0x18] sm:$0xff]  ;;  %v367_v7 = vld [vmem:[#allocation6] sm:$0xff]  ;;  %vm293_vm1 = vcmask 261120   ;;  %vm468_vm2 = vcmask 1043456  }
  0x59   : > { %728 = vmatprep.subr.bf16.mxu1 %v955_v0  ;;  %719 = vmatprep.mubr.msk.f32.mxu1 %vm956_vm0, %v957_v1  ;;  %v368_v8 = vld [vmem:[#allocation6 + $0x8] sm:$0xff]  ;;  %v369_v9 = vld [vmem:[#allocation6 + $0x10] sm:$0xff]  ;;  %v370_v10 = vld [vmem:[#allocation6 + $0x18] sm:$0xff]  ;;  %v726_v11 = vpack.c.bf16 %v1167_v6, %v1163_v4  ;;  %s472_s19 = sld [smem:[#allocation2]]  ;;  %v958_v44 = vmov 1966171168  }
  0x5a   : > { %724 = vmatpush3.bf16.msra.mxu0 %v723_v5  ;;  %v729_v12 = vpack.c.bf16 %v368_v8, %v367_v7  ;;  %v732_v13 = vpack.c.bf16 %v370_v10, %v369_v9  ;;  %v371_v14 = vld [vmem:[#allocation6 + $0x20] sm:$0xff]  ;;  %v372_v15 = vld [vmem:[#allocation6 + $0x28] sm:$0xff]  ;;  %v373_v18 = vld [vmem:[#allocation6 + $0x30] sm:$0xff]  ;;  %v484_v45 = vunpack.c.l.s4 %v958_v44  ;;  %v487_v48 = vshrl.u32 %v486_v46, 7  ;;  %s653_s18 = sshll.u32 %s1021_s5, 9  ;;  %s285_s9 = scalar_lea.vmem [#allocation8], %s640_s16 }
  0x5b   : > { %725 = vmatprep.subr.bf16.mxu0 %v955_v0  ;;  %v292_v16 = vld [vmem:[%s1237_s1] sm:$0xf]  ;;  %v735_v17 = vpack.c.bf16 %v372_v15, %v371_v14  ;;  %v374_v19 = vld [vmem:[#allocation6 + $0x38] sm:$0xff]  ;;  %v376_v22 = vld [vmem:[#allocation6 + $0x48] sm:$0xff]  ;;  %s549_s8 = sshll.u32 %s285_s9, 4  ;;  %s1189_s17 = scalar_lea.hbm %s1242_s6, %s653_s18  ;;  %s1191_s8 = int_to_ptr.vmem [resolvable:$true] %s549_s8 }
  0x5c   : > { %730 = vmatpush3.bf16.msra.mxu1 %v729_v12  ;;  %v738_v20 = vpack.c.bf16 %v374_v19, %v373_v18  ;;  %v375_v21 = vld [vmem:[#allocation6 + $0x40] sm:$0xff]  ;;  %v377_v24 = vld [vmem:[#allocation6 + $0x50] sm:$0xff]  ;;  %v378_v25 = vld [vmem:[#allocation6 + $0x58] sm:$0xff]  ;;  %v485_v47 = vunpack.c.0.s8 %v484_v45  ;;  %v509_v57 = vsub.s32 0, %v487_v48  ;;  %s536_s5 = scalar_lea.sflag [#allocation5], %s1145_s27  ;;  %s879_s16 = scalar_lea.vmem %s1191_s8, 512 }
  0x5d   : > { %731 = vmatprep.subr.bf16.mxu1 %v955_v0  ;;  %v741_v23 = vpack.c.bf16 %v376_v22, %v375_v21  ;;  %v744_v26 = vpack.c.bf16 %v378_v25, %v377_v24  ;;  %v379_v27 = vld [vmem:[#allocation6 + $0x60] sm:$0xff]  ;;  %v380_v28 = vld [vmem:[#allocation6 + $0x68] sm:$0xff]  ;;  %v381_v30 = vld [vmem:[#allocation6 + $0x70] sm:$0xff]  ;;  %p880_p4 = scmp.ne.s32.totalorder %s1191_s8, %s879_s16  ;;  %s959_s12 = smov [#allocation8]  }
  0x5e   : > { %727 = vmatpush3.bf16.msra.mxu0 %v726_v11  ;;  %v747_v29 = vpack.c.bf16 %v380_v28, %v379_v27  ;;  %v382_v31 = vld [vmem:[#allocation6 + $0x78] sm:$0xff]  ;;  %v645_v33 = vld [vmem:[%s1240_s4] ss:$0 sm:$0xff]  ;;  %v488_v52 = vsub.s32 %v485_v47, %v487_v48  ;;  %s883_s28 = sshll.u32 %s959_s12, 4  ;;  %s884_s28 = int_to_ptr.vmem [resolvable:$false] %s883_s28 }
  0x5f   : > { %v750_v32 = vpack.c.bf16 %v382_v31, %v381_v30  ;;  %v473_v39 = vstv %s472_s19  ;;  %v644_v49 = vld [vmem:[%s1239_s3] ss:$0 sm:$0xff]  ;;  %p881_p6 = pnand %p880_p4, %p1094_p12  ;;  %s885_s30 = scalar_lea.vmem %s884_s28, 1024 }
  0x60   : > { %733 = vmatpush3.bf16.msra.mxu1 %v732_v13  ;;  %p886_p10 = scmp.lt.s32.totalorder %s1191_s8, %s884_s28  ;;  %p887_p13 = scmp.lt.s32.totalorder %s885_s30, %s879_s16 }
  0x61   : > { %685 = vmatmul.mubr.msk.f32.vlgmr.msra.gmra.mrb[0].mxu0 %vm293_vm1, %v292_v16  ;;  %734 = vmatprep.subr.bf16.mxu1 %v955_v0  ;;  %p882_p8 = pneg %p881_p6 }
  0x62   : > { %p888_p3 = por %p887_p13, %p886_p10 }
  0x64   : > { %736 = vmatpush3.bf16.msra.mxu1 %v735_v17  ;;  %p889_p7 = pnand %p888_p3, %p882_p8 }
  0x65   : > { %737 = vmatprep.subr.bf16.mxu1 %v955_v0 }
  0x68   : > { %739 = vmatpush3.bf16.msra.mxu1 %v738_v20 }
  0x69   : > { %740 = vmatprep.subr.bf16.mxu1 %v955_v0 }
  0x6c   : > { %742 = vmatpush3.bf16.msra.mxu1 %v741_v23 }
  0x6d   : > { %743 = vmatprep.subr.bf16.mxu1 %v955_v0 }
  0x70   : > { %745 = vmatpush3.bf16.msra.mxu1 %v744_v26 }
  0x71   : > { %746 = vmatprep.subr.bf16.mxu1 %v955_v0 }
  0x74   : > { %748 = vmatpush3.bf16.msra.mxu1 %v747_v29 }
  0x75   : > { %749 = vmatprep.subr.bf16.mxu1 %v955_v0 }
  0x78   : > { %751 = vmatpush3.bf16.msra.mxu1 %v750_v32 }
 0x134   : > { %v363_v34 = vpop.f32.mrb[0].mxu0 }
 0x135   : > { %v686_v35 = vpop.f32.mrb[1].mxu0  ;;  %720 = vmatmul.mubr.f32.vlgmr.msra.gmra.mrb[0].mxu1 %v363_v34  ;;  %v467_v36 = vmul.f32 %v645_v33, %v363_v34 }
 0x137   : > { %v469_v37 = vsel %vm468_vm2, %v467_v36, 0.0 }
 0x138   : > { %470 = vadd.xlane.f32.xlu0 %v469_v37 }
 0x1c5   : > { %v471_v38 = vpop.xlane.xlu0 %470 }
 0x1c6   : > { %v474_v40 = vadd.f32 %v473_v39, %v471_v38 }
 0x1c8   : > { %v646_v41 = vmul.f32 -1.442695, %v474_v40 }
 0x1ca   : > { %817 = vpow2.f32 %v646_v41 }
 0x1d4   : > { %v818_v42 = vpop.eup %817 }
 0x1d5   : > { %v478_v43 = vadd.f32 1.0, %v818_v42 }
 0x1d7   : > { %819 = vrcp.f32 %v478_v43 }
 0x1e1   : > { %v820_v54 = vpop.eup %819 }
 0x208   : > { %v456_v50 = vpop.f32.mrb[0].mxu1 }
 0x209   : > { %v457_v51 = vadd.f32 %v644_v49, %v456_v50  ;;  %v721_v53 = vpop.f32.mrb[1].mxu1 }
 0x20b   : > { %v481_v55 = vmul.f32 %v820_v54, %v457_v51 }
 0x20d   : > { %v489_v56 = vrot.slane %v481_v55, %v488_v52 }
 0x20f   : > { %v490_v58 = vcombine.high %v489_v56, %v489_v56  ;;  %v497_v59 = vrot.slane %v489_v56, %v488_v52 }
 0x211   : > { %v504_v60 = vrot.slane %v490_v58, %v488_v52  ;;  %v505_v61 = vcombine.high %v497_v59, %v497_v59  ;;  %v510_v62 = vrot.slane %v497_v59, %v509_v57 }
 0x213   : > { %v506_v63 = vcombine.high %v504_v60, %v504_v60  ;;  %v514_v0 = vrot.slane %v504_v60, %v509_v57  ;;  %v518_v1 = vrot.slane %v505_v61, %v509_v57  ;;  %v527_v5 = vadd.f32 %v510_v62, %v1159_v2 }
 0x215   : > { %v522_v7 = vrot.slane %v506_v63, %v509_v57  ;;  %v528_v8 = vadd.f32 %v514_v0, %v1161_v3  ;;  %v529_v9 = vadd.f32 %v518_v1, %v1163_v4  ;;  %531 = vst [vmem:[%s285_s9] sm:$0xff] %v527_v5 }
 0x217   : > { %v530_v2 = vadd.f32 %v522_v7, %v1167_v6  ;;  %532 = vst [vmem:[%s285_s9 + $0x8] sm:$0xff] %v528_v8  ;;  %533 = vst [vmem:[%s285_s9 + $0x10] sm:$0xff] %v529_v9 }
 0x219   : > { %534 = vst [vmem:[%s285_s9 + $0x18] sm:$0xff] %v530_v2 }
 0x21a   : > { %892 = shalt.err (!%p889_p7)
}
 0x21b   : > { %s893_s21 = scalar_lea.hbm %s1189_s17, 512  ;;  %s897_s11 = scalar_lea.hbm %s1242_s6, 1024 }
 0x21c   : > { %p894_p9 = scmp.ne.s32.totalorder %s1189_s17, %s893_s21  ;;  %p898_p5 = scmp.lt.u32.totalorder %s1189_s17, %s1242_s6 }
 0x21d   : > { %p899_p11 = scmp.lt.u32.totalorder %s897_s11, %s893_s21  ;;  %p901_p4 = scmp.lt.u32.totalorder %s893_s21, %s1189_s17 }
 0x21e   : > { %p895_p1 = pnand %p894_p9, %p1094_p12 }
 0x21f   : > { %p900_p2 = por %p899_p11, %p898_p5 }
 0x220   : > { %p896_p0 = pneg %p895_p1 }
 0x221   : > { %p902_p6 = por %p901_p4, %p900_p2 }
 0x223   : > { %p903_p8 = pnand %p902_p6, %p896_p0 }
 0x225   : > { %906 = shalt.err (!%p903_p8)
}
 0x226   : > { %s960_s9 = smov 128   ;;  %s961_s7 = smov 8  }
 0x227   : > { %758 = dma.vmem_to_hbm [thread:$0]  (%p1094_p12), %s1191_s8, 512, %s1189_s17, %s536_s5, %s960_s9, %s960_s9, %s961_s7  }
 0x228 PF: > { %s564_s15 = sand.u32 1, %s937_s23   ;;  %p1257_p10 = scmp.ne.s32.totalorder %s1247_s29, 0 }
 0x229   : > { %p1258_p13 = scmp.ge.s32.totalorder %s949_s26, 2  ;;  %s565_s16 = scalar_lea.sflag [#allocation5], %s564_s15 }
 0x22b   : > { %p769_p3 = pnand %p1258_p13, %p1257_p10 }
 0x22d   : > { %932 = dma.done.wait (!%p769_p3), %s565_s16, 512  }
 0x22e   : > { %934 = vsyncadd (!%p769_p3), %s565_s16, 4294966784  ;;  %p21_p7 = scmp.ge.s32.totalorder %s1056_s10, 4   ;;  %s1259_s23 = smov %s941_s24 }
 0x22f   : > { %s1260_s24 = smov %s945_s25  ;;  %s1261_s25 = smov %s1090_s13 }
 0x230   : > { %s1262_s26 = smov %s1056_s10  ;;  %23 = sbr.rel (!%p21_p7) target bundleno = 8 (0x8), region = 93 }
 0x237   :  { %570 = vsyncpa [#allocation4], 1 }
 0x238   :  { %572 = vsyncpa [#allocation4 + $0x1], 1 }
 0x239   :  { %573 = vsyncpa [#allocation7], 1 }
 0x23a   :  { %574 = vsyncpa [#allocation5], 1 }
 0x23b   :  { %576 = vsyncpa [#allocation5 + $0x1], 1 }

</bundles_post_ra>
